<compile_context>
chip_gen: v6e
topology: v6e:2x2x1
jax: 0.10.0
libtpu: 0.0.40
codegen_flags: <defaults>
</compile_context>

<pallas_src>
import functools

import jax
import jax.numpy as jnp
from jax.experimental import pallas as pl
from jax.experimental.pallas import tpu as pltpu


# ---------------------------------------------------------------------------
# DFXP quantizer (value quantization only).
# ---------------------------------------------------------------------------
def _dfxp_quantize(x, bits, step):
    """ActivationQuantizer / WeightQuantizer forward (fixed step)."""
    if bits >= 32:
        return x
    qmin = -(2.0 ** (bits - 1))
    qmax = 2.0 ** (bits - 1) - 1.0
    # TODO(synk): dfxp_backend also dynamically adapts `step` from overflow
    # statistics (update_step=True); here the step is a fixed constant.
    return jnp.clip(jnp.round(x / step), qmin, qmax) * step


# ---------------------------------------------------------------------------
# Fused-sequence kernel: grid=(B//tb, T), weights resident, h/c in scratch.
# ---------------------------------------------------------------------------
def _lstm_seq_kernel(x_ref, wx_ref, wh_ref, b_ref, h0_ref, c0_ref,
                     hseq_ref, clast_ref, h_scr, c_scr,
                     *, bits, step, hidden_size, matmul_dtype):
    H = hidden_size
    q = lambda v: _dfxp_quantize(v, bits, step)

    t = pl.program_id(1)                         # time axis (inner, recurrent)
    t_last = pl.num_programs(1) - 1

    @pl.when(t == 0)
    def _():
        # Fresh batch tile: load initial state into the VMEM carry.
        h_scr[...] = h0_ref[...].astype(jnp.float32)
        c_scr[...] = c0_ref[...].astype(jnp.float32)

    # input_q(cat(X, h)) == quantize X and h separately (same elementwise op).
    x = q(x_ref[0].astype(jnp.float32))          # (tb, I)
    h = q(h_scr[...])                            # (tb, H)
    c = q(c_scr[...])                            # cell_q

    # y = F.linear([X, h], W, b): two MXU calls into one f32 accumulator.
    # Weights were already quantized (weight_q / bias_q) once in the wrapper.
    y = (jnp.dot(x.astype(matmul_dtype), wx_ref[...],
                 preferred_element_type=jnp.float32)
         + jnp.dot(h.astype(matmul_dtype), wh_ref[...],
                   preferred_element_type=jnp.float32)
         + b_ref[...].astype(jnp.float32))       # (tb, 4H), gate axis = lanes

    # Gate slices are tile-aligned (free views) whenever H is a multiple of
    # 128 (true for real GNMT H=1024); for the tiny test H=32 they are
    # sub-vreg extracts, which is fine for correctness.
    i = q(jax.nn.sigmoid(y[:, 0 * H:1 * H]))     # igate_q
    f = q(jax.nn.sigmoid(y[:, 1 * H:2 * H]))     # fgate_q
    g = q(jnp.tanh(y[:, 2 * H:3 * H]))           # ggate_q
    o = q(jax.nn.sigmoid(y[:, 3 * H:4 * H]))     # ogate_q

    c_new = c * f + i * g
    cell_tanh = q(jnp.tanh(c_new))               # cell_tanh_q
    h_new = cell_tanh * o

    # Carry state in VMEM (never round-trips HBM between timesteps).
    h_scr[...] = h_new
    c_scr[...] = c_new

    hseq_ref[0] = h_new.astype(hseq_ref.dtype)

    @pl.when(t == t_last)
    def _():
        # Revisited output block: only this final value is written back.
        clast_ref[...] = c_new.astype(clast_ref.dtype)


# ---------------------------------------------------------------------------
# Wrappers.
# ---------------------------------------------------------------------------
def prepare_params(weight, bias, input_size, *, bits=32, step=2.0 ** (-5),
                   matmul_dtype=jnp.float32):
    """One-time prep: quantize (weight_q/bias_q), split the fused PyTorch
    (4H, I+H) weight into Wx:(I,4H) / Wh:(H,4H) and cast matmul operands."""
    four_h = weight.shape[0]
    wq = _dfxp_quantize(weight.astype(jnp.float32), bits, step)
    bq = _dfxp_quantize(bias.astype(jnp.float32), bits, step)
    wx = jnp.asarray(wq[:, :input_size].T, dtype=matmul_dtype)   # (I, 4H)
    wh = jnp.asarray(wq[:, input_size:].T, dtype=matmul_dtype)   # (H, 4H)
    b2 = bq.reshape(1, four_h)                                   # (1, 4H) f32
    return wx, wh, b2


def lstm_q_sequence(x_seq, wx, wh, b2, h0, c0, *, bits=32, step=2.0 ** (-5),
                    batch_tile=None, vmem_limit_bytes=None):
    """Run T fused LSTMCell_q steps. Returns (h_seq:(T,B,H), c_last:(B,H)).

    batch_tile: optional batch tile size (must divide B).  With more than one
    tile, the leading grid axis is "parallel" so v7x's two TensorCores split
    the batch; the time axis stays "arbitrary" (recurrent).
    """
    T, B, I = x_seq.shape
    H = wh.shape[0]
    four_h = 4 * H

    tb = B if batch_tile is None else batch_tile
    assert B % tb == 0, "batch_tile must divide the batch size"
    nb = B // tb

    kernel = functools.partial(_lstm_seq_kernel, bits=bits, step=step,
                               hidden_size=H, matmul_dtype=wx.dtype)

    h_seq, c_last = pl.pallas_call(
        kernel,
        out_shape=(jax.ShapeDtypeStruct((T, B, H), x_seq.dtype),
                   jax.ShapeDtypeStruct((B, H), x_seq.dtype)),
        grid=(nb, T),
        in_specs=[
            pl.BlockSpec((1, tb, I), lambda b, t: (t, b, 0)),    # X_t streamed
            pl.BlockSpec((I, four_h), lambda b, t: (0, 0)),      # Wx resident
            pl.BlockSpec((H, four_h), lambda b, t: (0, 0)),      # Wh resident
            pl.BlockSpec((1, four_h), lambda b, t: (0, 0)),      # bias resident
            pl.BlockSpec((tb, H), lambda b, t: (b, 0)),          # h0 (per tile)
            pl.BlockSpec((tb, H), lambda b, t: (b, 0)),          # c0 (per tile)
        ],
        out_specs=(
            pl.BlockSpec((1, tb, H), lambda b, t: (t, b, 0)),    # h per step
            pl.BlockSpec((tb, H), lambda b, t: (b, 0)),          # final c
        ),
        scratch_shapes=[pltpu.VMEM((tb, H), jnp.float32),        # h carry
                        pltpu.VMEM((tb, H), jnp.float32)],       # c carry
        compiler_params=pltpu.CompilerParams(
            dimension_semantics=("parallel", "arbitrary"),
            vmem_limit_bytes=vmem_limit_bytes),
    )(x_seq, wx, wh, b2, h0, c0)
    return h_seq, c_last


def lstm_cell_q(X, weight, bias, hx=None, *, bits=32, step=2.0 ** (-5),
                matmul_dtype=jnp.float32):
    """Single-step forward matching LSTMCell_q.forward. Returns (h, c)."""
    B, I = X.shape
    H = weight.shape[0] // 4
    if hx is None:
        z = jnp.zeros((B, H), dtype=X.dtype)
        hx = (z, z)
    h0, c0 = hx
    wx, wh, b2 = prepare_params(weight, bias, I, bits=bits, step=step,
                                matmul_dtype=matmul_dtype)
    h_seq, c_last = lstm_q_sequence(X[None], wx, wh, b2, h0, c0,
                                    bits=bits, step=step)
    return h_seq[0], c_last


# ---------------------------------------------------------------------------
# Pure-JAX reference (mirrors the PyTorch module forward).
# ---------------------------------------------------------------------------
def _reference_step(X, weight, bias, h, c, bits=32, step=2.0 ** (-5)):
    q = lambda v: _dfxp_quantize(v, bits, step)
    xh = q(jnp.concatenate([X, h], axis=1))          # input_q
    w = q(weight)                                    # weight_q
    b = q(bias)                                      # bias_q
    y = xh @ w.T + b
    i, f, g, o = jnp.split(y, 4, axis=1)
    i = q(jax.nn.sigmoid(i))                         # igate_q
    f = q(jax.nn.sigmoid(f))                         # fgate_q
    g = q(jnp.tanh(g))                               # ggate_q
    o = q(jax.nn.sigmoid(o))                         # ogate_q
    c = q(c)                                         # cell_q
    c_new = c * f + i * g
    h_new = q(jnp.tanh(c_new)) * o                   # cell_tanh_q
    return h_new, c_new


def _reference_sequence(x_seq, weight, bias, h, c, bits=32, step=2.0 ** (-5)):
    hs = []
    for t in range(x_seq.shape[0]):
        h, c = _reference_step(x_seq[t], weight, bias, h, c, bits, step)
        hs.append(h)
    return jnp.stack(hs), c


# ---------------------------------------------------------------------------
# Test.
# ---------------------------------------------------------------------------
if __name__ == "__main__":
    B, input_size, hidden_size, T = 8, 32, 32, 6
    step = 2.0 ** (-5)

    key = jax.random.PRNGKey(0)
    k_x, k_w, k_b, k_h, k_c = jax.random.split(key, 5)

    # reset_parameters(): uniform(-stdv, stdv), stdv = hidden_size ** -0.5
    stdv = hidden_size ** (-0.5)
    weight = jax.random.uniform(
        k_w, (4 * hidden_size, input_size + hidden_size),
        minval=-stdv, maxval=stdv, dtype=jnp.float32)
    bias = jax.random.uniform(
        k_b, (4 * hidden_size,), minval=-stdv, maxval=stdv, dtype=jnp.float32)

    x_seq = jax.random.normal(k_x, (T, B, input_size), dtype=jnp.float32)
    h0 = 0.1 * jax.random.normal(k_h, (B, hidden_size), dtype=jnp.float32)
    c0 = 0.1 * jax.random.normal(k_c, (B, hidden_size), dtype=jnp.float32)

    # --- 1) single-step module forward (hx=None), bits=32 (exact path) -----
    h1, c1 = lstm_cell_q(x_seq[0], weight, bias, hx=None, bits=32, step=step)
    h1, c1 = jax.block_until_ready((h1, c1))
    z = jnp.zeros((B, hidden_size), jnp.float32)
    h1_ref, c1_ref = _reference_step(x_seq[0], weight, bias, z, z)
    assert jnp.allclose(h1, h1_ref, atol=1e-5, rtol=1e-5)
    assert jnp.allclose(c1, c1_ref, atol=1e-5, rtol=1e-5)

    # --- 2) fused recurrent sequence, f32 matmul, bits=32 ------------------
    wx, wh, b2 = prepare_params(weight, bias, input_size, bits=32, step=step)
    h_seq, c_last = lstm_q_sequence(x_seq, wx, wh, b2, h0, c0, bits=32,
                                    step=step)
    h_seq, c_last = jax.block_until_ready((h_seq, c_last))
    h_seq_ref, c_last_ref = _reference_sequence(x_seq, weight, bias, h0, c0)
    assert jnp.allclose(h_seq, h_seq_ref, atol=1e-5, rtol=1e-5)
    assert jnp.allclose(c_last, c_last_ref, atol=1e-5, rtol=1e-5)

    # --- 2b) same, but with batch tiling (megacore-style split) ------------
    h_seq_bt, c_last_bt = lstm_q_sequence(x_seq, wx, wh, b2, h0, c0, bits=32,
                                          step=step, batch_tile=B // 2)
    h_seq_bt, c_last_bt = jax.block_until_ready((h_seq_bt, c_last_bt))
    assert jnp.allclose(h_seq_bt, h_seq_ref, atol=1e-5, rtol=1e-5)
    assert jnp.allclose(c_last_bt, c_last_ref, atol=1e-5, rtol=1e-5)

    # --- 3) quantized path (bits=8), value quantization only ---------------
    bits_q = 8
    wx8, wh8, b28 = prepare_params(weight, bias, input_size, bits=bits_q,
                                   step=step)
    h_seq8, c_last8 = lstm_q_sequence(x_seq, wx8, wh8, b28, h0, c0,
                                      bits=bits_q, step=step)
    h_seq8, c_last8 = jax.block_until_ready((h_seq8, c_last8))
    h_seq8_ref, c_last8_ref = _reference_sequence(
        x_seq, weight, bias, h0, c0, bits=bits_q, step=step)
    # Loose tolerance: MXU vs. XLA matmul summation order can flip a value
    # sitting exactly on a quantization-rounding boundary (one step = 2^-5).
    assert jnp.all(jnp.isfinite(h_seq8)) and jnp.all(jnp.isfinite(c_last8))
    assert jnp.max(jnp.abs(h_seq8 - h_seq8_ref)) < 0.1
    assert jnp.max(jnp.abs(c_last8 - c_last8_ref)) < 0.1

    # --- 4) bf16 matmul-operand perf path (v5e/v6e/v7x MXU-native) ---------
    wxb, whb, b2b = prepare_params(weight, bias, input_size, bits=32,
                                   step=step, matmul_dtype=jnp.bfloat16)
    h_seq_b, c_last_b = lstm_q_sequence(x_seq, wxb, whb, b2b, h0, c0, bits=32,
                                        step=step)
    h_seq_b, c_last_b = jax.block_until_ready((h_seq_b, c_last_b))
    assert jnp.max(jnp.abs(h_seq_b - h_seq_ref)) < 0.1
    assert jnp.max(jnp.abs(c_last_b - c_last_ref)) < 0.1

    print("KERNEL_OK")
</pallas_src>

<mosaic_0001>
module attributes {stable_mosaic.version = 11 : i64} {
  func.func @_lstm_seq_kernel(%arg0: i32, %arg1: i32, %arg2: memref<1x8x32xf32, #tpu.memory_space<vmem>>, %arg3: memref<32x128xf32, #tpu.memory_space<vmem>>, %arg4: memref<32x128xf32, #tpu.memory_space<vmem>>, %arg5: memref<1x128xf32, #tpu.memory_space<vmem>>, %arg6: memref<8x32xf32, #tpu.memory_space<vmem>>, %arg7: memref<8x32xf32, #tpu.memory_space<vmem>>, %arg8: memref<1x8x32xf32, #tpu.memory_space<vmem>>, %arg9: memref<8x32xf32, #tpu.memory_space<vmem>>, %arg10: memref<8x32xf32, #tpu.memory_space<vmem>>, %arg11: memref<8x32xf32, #tpu.memory_space<vmem>>) attributes {dimension_semantics = [#tpu.dimension_semantics<parallel>, #tpu.dimension_semantics<arbitrary>], iteration_bounds = array<i64: 1, 1>, scalar_prefetch = 0 : i64, scratch_operands = 2 : i64, tpu.core_type = #tpu.core_type<tc>, window_params = [{transform_indices = @transform_0, window_bounds = array<i64: 1, 8, 32>}, {pipeline_mode = #tpu.pipeline_mode<synchronous>, transform_indices = @transform_1, window_bounds = array<i64: 32, 128>}, {pipeline_mode = #tpu.pipeline_mode<synchronous>, transform_indices = @transform_2, window_bounds = array<i64: 32, 128>}, {pipeline_mode = #tpu.pipeline_mode<synchronous>, transform_indices = @transform_3, window_bounds = array<i64: 1, 128>}, {transform_indices = @transform_4, window_bounds = array<i64: 8, 32>}, {transform_indices = @transform_5, window_bounds = array<i64: 8, 32>}, {transform_indices = @transform_6, window_bounds = array<i64: 1, 8, 32>}, {transform_indices = @transform_7, window_bounds = array<i64: 8, 32>}]} {
    %c0_i32 = arith.constant 0 : i32
    %0 = arith.cmpi eq, %arg1, %c0_i32 : i32
    %1 = arith.extui %0 : i1 to i32
    %c0_i32_0 = arith.constant 0 : i32
    %2 = arith.cmpi ne, %1, %c0_i32_0 : i32
    scf.if %2 {
      %c0_26 = arith.constant 0 : index
      %c0_27 = arith.constant 0 : index
      %48 = vector.load %arg6[%c0_26, %c0_27] : memref<8x32xf32, #tpu.memory_space<vmem>>, vector<8x32xf32>
      %c0_28 = arith.constant 0 : index
      %c0_29 = arith.constant 0 : index
      %49 = vector.load %arg10[%c0_28, %c0_29] : memref<8x32xf32, #tpu.memory_space<vmem>>, vector<8x32xf32>
      tpu.vector_store %arg10[%c0_28, %c0_29], %48 {strides = array<i32>} : memref<8x32xf32, #tpu.memory_space<vmem>>, vector<8x32xf32>,
      %c0_30 = arith.constant 0 : index
      %c0_31 = arith.constant 0 : index
      %50 = vector.load %arg7[%c0_30, %c0_31] : memref<8x32xf32, #tpu.memory_space<vmem>>, vector<8x32xf32>
      %c0_32 = arith.constant 0 : index
      %c0_33 = arith.constant 0 : index
      %51 = vector.load %arg11[%c0_32, %c0_33] : memref<8x32xf32, #tpu.memory_space<vmem>>, vector<8x32xf32>
      tpu.vector_store %arg11[%c0_32, %c0_33], %50 {strides = array<i32>} : memref<8x32xf32, #tpu.memory_space<vmem>>, vector<8x32xf32>,
    } else {
    }
    %c0 = arith.constant 0 : index
    %c0_1 = arith.constant 0 : index
    %c0_2 = arith.constant 0 : index
    %3 = vector.load %arg2[%c0, %c0_1, %c0_2] : memref<1x8x32xf32, #tpu.memory_space<vmem>>, vector<1x8x32xf32>
    %4 = vector.shape_cast %3 : vector<1x8x32xf32> to vector<8x32xf32>
    %c0_3 = arith.constant 0 : index
    %c0_4 = arith.constant 0 : index
    %5 = vector.load %arg10[%c0_3, %c0_4] : memref<8x32xf32, #tpu.memory_space<vmem>>, vector<8x32xf32>
    %c0_5 = arith.constant 0 : index
    %c0_6 = arith.constant 0 : index
    %6 = vector.load %arg11[%c0_5, %c0_6] : memref<8x32xf32, #tpu.memory_space<vmem>>, vector<8x32xf32>
    %c0_7 = arith.constant 0 : index
    %c0_8 = arith.constant 0 : index
    %7 = vector.load %arg3[%c0_7, %c0_8] : memref<32x128xf32, #tpu.memory_space<vmem>>, vector<32x128xf32>
    %cst = arith.constant dense<0.000000e+00> : vector<8x128xf32>
    %8 = tpu.matmul %4, %7, %cst {dimension_numbers = #tpu.dot_dimension_numbers<[1], [0], [0], [1], [0, 0, 1, 1], [], []>} : vector<8x32xf32>, vector<32x128xf32>, vector<8x128xf32> -> vector<8x128xf32>
    %c0_9 = arith.constant 0 : index
    %c0_10 = arith.constant 0 : index
    %9 = vector.load %arg4[%c0_9, %c0_10] : memref<32x128xf32, #tpu.memory_space<vmem>>, vector<32x128xf32>
    %cst_11 = arith.constant dense<0.000000e+00> : vector<8x128xf32>
    %10 = tpu.matmul %5, %9, %cst_11 {dimension_numbers = #tpu.dot_dimension_numbers<[1], [0], [0], [1], [0, 0, 1, 1], [], []>} : vector<8x32xf32>, vector<32x128xf32>, vector<8x128xf32> -> vector<8x128xf32>
    %11 = arith.addf %8, %10 : vector<8x128xf32>
    %c0_12 = arith.constant 0 : index
    %c0_13 = arith.constant 0 : index
    %12 = vector.load %arg5[%c0_12, %c0_13] : memref<1x128xf32, #tpu.memory_space<vmem>>, vector<1x128xf32>
    %13 = vector.broadcast %12 : vector<1x128xf32> to vector<8x128xf32>
    %14 = arith.addf %11, %13 : vector<8x128xf32>
    %15 = vector.extract_strided_slice %14 {offsets = [0, 0], sizes = [8, 32], strides = [1, 1]} : vector<8x128xf32> to vector<8x32xf32>
    %16 = arith.negf %15 : vector<8x32xf32>
    %17 = math.exp %16 : vector<8x32xf32>
    %cst_14 = arith.constant 1.000000e+00 : f32
    %18 = vector.broadcast %cst_14 : f32 to vector<8x32xf32>
    %19 = arith.addf %18, %17 : vector<8x32xf32>
    %20 = arith.divf %18, %19 : vector<8x32xf32>
    %21 = vector.extract_strided_slice %14 {offsets = [0, 32], sizes = [8, 32], strides = [1, 1]} : vector<8x128xf32> to vector<8x32xf32>
    %22 = arith.negf %21 : vector<8x32xf32>
    %23 = math.exp %22 : vector<8x32xf32>
    %cst_15 = arith.constant 1.000000e+00 : f32
    %24 = vector.broadcast %cst_15 : f32 to vector<8x32xf32>
    %25 = arith.addf %24, %23 : vector<8x32xf32>
    %26 = arith.divf %24, %25 : vector<8x32xf32>
    %27 = vector.extract_strided_slice %14 {offsets = [0, 64], sizes = [8, 32], strides = [1, 1]} : vector<8x128xf32> to vector<8x32xf32>
    %28 = math.tanh %27 : vector<8x32xf32>
    %29 = vector.extract_strided_slice %14 {offsets = [0, 96], sizes = [8, 32], strides = [1, 1]} : vector<8x128xf32> to vector<8x32xf32>
    %30 = arith.negf %29 : vector<8x32xf32>
    %31 = math.exp %30 : vector<8x32xf32>
    %cst_16 = arith.constant 1.000000e+00 : f32
    %32 = vector.broadcast %cst_16 : f32 to vector<8x32xf32>
    %33 = arith.addf %32, %31 : vector<8x32xf32>
    %34 = arith.divf %32, %33 : vector<8x32xf32>
    %35 = arith.mulf %6, %26 : vector<8x32xf32>
    %36 = arith.mulf %20, %28 : vector<8x32xf32>
    %37 = arith.addf %35, %36 : vector<8x32xf32>
    %38 = math.tanh %37 : vector<8x32xf32>
    %39 = arith.mulf %38, %34 : vector<8x32xf32>
    %c0_17 = arith.constant 0 : index
    %c0_18 = arith.constant 0 : index
    %40 = vector.load %arg10[%c0_17, %c0_18] : memref<8x32xf32, #tpu.memory_space<vmem>>, vector<8x32xf32>
    tpu.vector_store %arg10[%c0_17, %c0_18], %39 {strides = array<i32>} : memref<8x32xf32, #tpu.memory_space<vmem>>, vector<8x32xf32>,
    %c0_19 = arith.constant 0 : index
    %c0_20 = arith.constant 0 : index
    %41 = vector.load %arg11[%c0_19, %c0_20] : memref<8x32xf32, #tpu.memory_space<vmem>>, vector<8x32xf32>
    tpu.vector_store %arg11[%c0_19, %c0_20], %37 {strides = array<i32>} : memref<8x32xf32, #tpu.memory_space<vmem>>, vector<8x32xf32>,
    %c0_21 = arith.constant 0 : index
    %c0_22 = arith.constant 0 : index
    %c0_23 = arith.constant 0 : index
    %42 = vector.load %arg8[%c0_21, %c0_22, %c0_23] : memref<1x8x32xf32, #tpu.memory_space<vmem>>, vector<1x8x32xf32>
    %43 = vector.shape_cast %42 : vector<1x8x32xf32> to vector<8x32xf32>
    %44 = vector.shape_cast %39 : vector<8x32xf32> to vector<1x8x32xf32>
    tpu.vector_store %arg8[%c0_21, %c0_22, %c0_23], %44 {strides = array<i32>} : memref<1x8x32xf32, #tpu.memory_space<vmem>>, vector<1x8x32xf32>,
    %c0_i32_24 = arith.constant 0 : i32
    %45 = arith.cmpi eq, %arg1, %c0_i32_24 : i32
    %46 = arith.extui %45 : i1 to i32
    %c0_i32_25 = arith.constant 0 : i32
    %47 = arith.cmpi ne, %46, %c0_i32_25 : i32
    scf.if %47 {
      %c0_26 = arith.constant 0 : index
      %c0_27 = arith.constant 0 : index
      %48 = vector.load %arg9[%c0_26, %c0_27] : memref<8x32xf32, #tpu.memory_space<vmem>>, vector<8x32xf32>
      tpu.vector_store %arg9[%c0_26, %c0_27], %37 {strides = array<i32>} : memref<8x32xf32, #tpu.memory_space<vmem>>, vector<8x32xf32>,
    } else {
    }
    return
  }
  func.func @transform_0(%arg0: i32, %arg1: i32) -> (i32, i32, i32) {
    %c0_i32 = arith.constant 0 : i32
    %c0_i32_0 = arith.constant 0 : i32
    return %arg1, %arg0, %c0_i32 : i32, i32, i32
  }
  func.func @transform_1(%arg0: i32, %arg1: i32) -> (i32, i32) {
    %c0_i32 = arith.constant 0 : i32
    %c0_i32_0 = arith.constant 0 : i32
    %c0_i32_1 = arith.constant 0 : i32
    return %c0_i32, %c0_i32_0 : i32, i32
  }
  func.func @transform_2(%arg0: i32, %arg1: i32) -> (i32, i32) {
    %c0_i32 = arith.constant 0 : i32
    %c0_i32_0 = arith.constant 0 : i32
    %c0_i32_1 = arith.constant 0 : i32
    return %c0_i32, %c0_i32_0 : i32, i32
  }
  func.func @transform_3(%arg0: i32, %arg1: i32) -> (i32, i32) {
    %c0_i32 = arith.constant 0 : i32
    %c0_i32_0 = arith.constant 0 : i32
    %c0_i32_1 = arith.constant 0 : i32
    return %c0_i32, %c0_i32_0 : i32, i32
  }
  func.func @transform_4(%arg0: i32, %arg1: i32) -> (i32, i32) {
    %c0_i32 = arith.constant 0 : i32
    %c0_i32_0 = arith.constant 0 : i32
    return %arg0, %c0_i32 : i32, i32
  }
  func.func @transform_5(%arg0: i32, %arg1: i32) -> (i32, i32) {
    %c0_i32 = arith.constant 0 : i32
    %c0_i32_0 = arith.constant 0 : i32
    return %arg0, %c0_i32 : i32, i32
  }
  func.func @transform_6(%arg0: i32, %arg1: i32) -> (i32, i32, i32) {
    %c0_i32 = arith.constant 0 : i32
    %c0_i32_0 = arith.constant 0 : i32
    return %arg1, %arg0, %c0_i32 : i32, i32, i32
  }
  func.func @transform_7(%arg0: i32, %arg1: i32) -> (i32, i32) {
    %c0_i32 = arith.constant 0 : i32
    %c0_i32_0 = arith.constant 0 : i32
    return %arg0, %c0_i32 : i32, i32
  }
}

</mosaic_0001>

<bundles_post_ra>
// kernel: tpu_custom_call.1
= control target key start
LH: loop header
LB: loop body
LE: loop exit
PB: predicated region body
PF: predicated region fallthrough
CT: control target
= control target key end

     0   :  { %13 = vsyncpa [#allocation5], 0  ;;  %s586_s0 = inlined_call_operand.hbm [shape: f32[1,8,32], index: 0, kind: input, shape index: {}]   ;;  %s587_s1 = inlined_call_operand.hbm [shape: f32[32,128], index: 1, kind: input, shape index: {}]   ;;  %s588_s2 = inlined_call_operand.hbm [shape: f32[32,128], index: 2, kind: input, shape index: {}]   ;;  %s589_s3 = inlined_call_operand.vmem [shape: f32[1,128], index: 3, kind: input, shape index: {}]   ;;  %s590_s4 = inlined_call_operand.hbm [shape: f32[8,32], index: 4, kind: input, shape index: {}]   ;;  %s591_s5 = inlined_call_operand.vmem [shape: f32[8,32], index: 5, kind: input, shape index: {}]   ;;  %s592_s6 = inlined_call_operand.hbm [shape: f32[1,8,32], index: 6, kind: output, shape index: {0}]   ;;  %s593_s7 = inlined_call_operand.hbm [shape: f32[8,32], index: 7, kind: output, shape index: {1}]  }
   0x1   :  { %14 = vsyncpa [#allocation8], 0 }
   0x2   :  { %15 = vsyncpa [#allocation11], 0 }
   0x3   :  { %16 = vsyncpa [#allocation6], 0 }
   0x4   :  { %17 = vsyncpa [#allocation14], 0  ;;  %s501_s24 = smov [#allocation7]  }
   0x5   :  { %s33_s25 = sshll.u32 %s501_s24, 4  ;;  %s34_s25 = int_to_ptr.vmem [resolvable:$true] %s33_s25 }
   0x6   :  { %s379_s26 = scalar_lea.vmem %s34_s25, 512  ;;  %p384_p1 = scmp.lt.s32.totalorder %s34_s25, %s34_s25 }
   0x7   :  { %p380_p0 = scmp.ne.s32.totalorder %s34_s25, %s379_s26  ;;  %p385_p2 = scmp.lt.s32.totalorder %s379_s26, %s379_s26 }
   0x9   :  { %p386_p3 = por %p385_p2, %p384_p1 }
   0xb   :  { %p387_p4 = pnand %p386_p3, %p380_p0 }
   0xd   :  { %390 = shalt.err (!%p387_p4)
}
   0xe   :  { %s502_s27 = smov 128   ;;  %s503_s28 = smov 8  }
   0xf   :  { %39 = dma.hbm_to_vmem [thread:$0]  %s587_s1, 512, %s34_s25, [#allocation8], %s502_s27, %s502_s27, %s503_s28  }
  0x10   :  { %s504_s8 = smov [#allocation4]   ;;  %s505_s10 = smov [#allocation9]  }
  0x11   :  { %s24_s9 = sshll.u32 %s504_s8, 4  ;;  %s45_s11 = sshll.u32 %s505_s10, 4  ;;  %s25_s9 = int_to_ptr.vmem [resolvable:$true] %s24_s9  ;;  %s46_s11 = int_to_ptr.vmem [resolvable:$true] %s45_s11 }
  0x12   :  { %s399_s12 = scalar_lea.vmem %s25_s9, 128  ;;  %p404_p6 = scmp.lt.s32.totalorder %s25_s9, %s25_s9 }
  0x13   :  { %p400_p5 = scmp.ne.s32.totalorder %s25_s9, %s399_s12  ;;  %p405_p7 = scmp.lt.s32.totalorder %s399_s12, %s399_s12 }
  0x15   :  { %p406_p8 = por %p405_p7, %p404_p6 }
  0x17   :  { %p407_p9 = pnand %p406_p8, %p400_p5 }
  0x19   :  { %410 = shalt.err (!%p407_p9)
}
  0x1a   :  { %27 = dma.hbm_to_vmem [thread:$0]  %s586_s0, 128, %s25_s9, [#allocation5]  }
  0x1b   :  { %s419_s15 = scalar_lea.vmem %s46_s11, 512  ;;  %p424_p11 = scmp.lt.s32.totalorder %s46_s11, %s46_s11 }
  0x1c   :  { %p420_p10 = scmp.ne.s32.totalorder %s46_s11, %s419_s15  ;;  %p425_p12 = scmp.lt.s32.totalorder %s419_s15, %s419_s15 }
  0x1e   :  { %p426_p13 = por %p425_p12, %p424_p11 }
  0x20   :  { %p427_p0 = pnand %p426_p13, %p420_p10 }
  0x22   :  { %430 = shalt.err (!%p427_p0)
}
  0x23   :  { %51 = dma.hbm_to_vmem [thread:$0]  %s588_s2, 512, %s46_s11, [#allocation8], %s502_s27, %s502_s27, %s503_s28  }
  0x24   :  { %s506_s17 = smov [#allocation10]  }
  0x25   :  { %s60_s18 = sshll.u32 %s506_s17, 4  ;;  %s61_s18 = int_to_ptr.vmem [resolvable:$true] %s60_s18 }
  0x26   :  { %s439_s19 = scalar_lea.vmem %s61_s18, 128  ;;  %p444_p2 = scmp.lt.s32.totalorder %s61_s18, %s61_s18 }
  0x27   :  { %p440_p1 = scmp.ne.s32.totalorder %s61_s18, %s439_s19  ;;  %p445_p3 = scmp.lt.s32.totalorder %s439_s19, %s439_s19 }
  0x29   :  { %p446_p4 = por %p445_p3, %p444_p2 }
  0x2b   :  { %p447_p5 = pnand %p446_p4, %p440_p1 }
  0x2d   :  { %450 = shalt.err (!%p447_p5)
}
  0x2e   :  { %63 = dma.hbm_to_vmem [thread:$0]  %s590_s4, 128, %s61_s18, [#allocation11]  }
  0x2f   :  { %491 = dma.done.wait [#allocation5], 128  }
  0x30   :  { %492 = vsyncadd [#allocation5], 4294967168 }
  0x31   :  { %493 = dma.done.wait [#allocation8], 1024  }
  0x32   :  { %494 = vsyncadd [#allocation8], 4294966272 }
  0x33   :  { %495 = dma.done.wait [#allocation11], 128  }
  0x34   :  { %496 = vsyncadd [#allocation11], 4294967168  ;;  %v507_v0 = vmov 0.0   ;;  %vm508_vm0 = vmmov 0   ;;  %v93_v1 = vld [vmem:[#allocation7 + $0x18] sm:$0xff]  ;;  %v92_v3 = vld [vmem:[#allocation7 + $0x10] sm:$0xff] }
  0x35   :  { %339 = vmatprep.subr.mxu1 %v507_v0  ;;  %328 = vmatprep.subr.mxu0 %v507_v0  ;;  %v97_v2 = vld [vmem:[#allocation9 + $0x18] sm:$0xff]  ;;  %vm83_vm1 = vcmask 261120   ;;  %v96_v4 = vld [vmem:[#allocation9 + $0x10] sm:$0xff]  ;;  %v91_v5 = vld [vmem:[#allocation7 + $0x8] sm:$0xff]  ;;  %s509_s22 = smov 32   ;;  %s510_s23 = smov 96  }
  0x36   :  { %347 = vmatprep.mubr.msk.f32.mxu1 %vm508_vm0, %v507_v0  ;;  %336 = vmatprep.mubr.msk.f32.mxu0 %vm508_vm0, %v507_v0  ;;  %v95_v6 = vld [vmem:[#allocation9 + $0x8] sm:$0xff]  ;;  %v82_v7 = vld [vmem:[#allocation10] sm:$0xff]  ;;  %v87_v11 = vld [vmem:[#allocation4] sm:$0xff]  ;;  %s511_s24 = smov 64  }
  0x37   :  { %340 = vmatpush3.msra.mxu1 %v93_v1  ;;  %329 = vmatpush3.msra.mxu0 %v97_v2  ;;  %84 = vst.msk [vmem:[#allocation2] sm:$0xff] %vm83_vm1, %v82_v7  ;;  %v85_v8 = vld [vmem:[%s591_s5] sm:$0xff]  ;;  %v90_v9 = vld [vmem:[#allocation7] sm:$0xff] }
  0x38   :  { %341 = vmatprep.subr.mxu1 %v507_v0  ;;  %330 = vmatprep.subr.mxu0 %v507_v0  ;;  %v94_v10 = vld [vmem:[#allocation9] sm:$0xff]  ;;  %86 = vst.msk [vmem:[#allocation3] sm:$0xff] %vm83_vm1, %v85_v8  ;;  %v316_v16 = vld [vmem:[%s589_s3] ss:$0 sm:$0xff]  ;;  %s512_s3 = smov [#allocation13]  }
  0x39   :  { %342 = vmatpush3.msra.mxu1 %v92_v3  ;;  %331 = vmatpush3.msra.mxu0 %v96_v4  ;;  %s299_s25 = sshll.u32 %s512_s3, 4  ;;  %s300_s25 = int_to_ptr.vmem [resolvable:$true] %s299_s25 }
  0x3a   :  { %343 = vmatprep.subr.mxu1 %v507_v0  ;;  %332 = vmatprep.subr.mxu0 %v507_v0  ;;  %s451_s26 = scalar_lea.vmem %s300_s25, 128  ;;  %p456_p7 = scmp.lt.s32.totalorder %s300_s25, %s300_s25 }
  0x3b   :  { %344 = vmatpush3.msra.mxu1 %v91_v5  ;;  %333 = vmatpush3.msra.mxu0 %v95_v6  ;;  %p452_p6 = scmp.ne.s32.totalorder %s300_s25, %s451_s26  ;;  %p457_p8 = scmp.lt.s32.totalorder %s451_s26, %s451_s26 }
  0x3c   :  { %345 = vmatprep.subr.mxu1 %v507_v0  ;;  %334 = vmatprep.subr.mxu0 %v507_v0 }
  0x3d   :  { %346 = vmatpush3.msra.mxu1 %v90_v9  ;;  %335 = vmatpush3.msra.mxu0 %v94_v10  ;;  %p458_p9 = por %p457_p8, %p456_p7 }
  0x3e   :  { %348 = vmatmul.mubr.msk.f32.vlgmr.msra.gmra.mxu1 %vm83_vm1, %v87_v11  ;;  %v88_v12 = vld [vmem:[#allocation2] sm:$0xff] }
  0x3f   :  { %337 = vmatmul.mubr.msk.f32.vlgmr.msra.gmra.mxu0 %vm83_vm1, %v88_v12  ;;  %v89_v26 = vld [vmem:[#allocation3] sm:$0xff]  ;;  %p459_p10 = pnand %p458_p9, %p452_p6 }
  0xfe   :  { %v241_v13 = vpop.f32.mrf.mxu1 }
  0xff   :  { %v168_v15 = vpop.f32.mrf.mxu0 }
 0x100   :  { %v349_v14 = vpop.f32.mrf.mxu1  ;;  %v242_v17 = vadd.f32 %v241_v13, %v168_v15 }
 0x101   :  { %v338_v18 = vpop.f32.mrf.mxu0 }
 0x102   :  { %v252_v19 = vadd.f32 %v316_v16, %v242_v17 }
 0x104   :  { %v317_v20 = vmul.f32 -1.442695, %v252_v19 }
 0x106   :  { %363 = vpow2.f32 %v317_v20 }
 0x113   :  { %v364_v21 = vpop.eup %363 }
 0x114   :  { %v256_v22 = vadd.f32 1.0, %v364_v21 }
 0x116   :  { %365 = vrcp.f32 %v256_v22 }
 0x117   :  { %367 = vtanh.f32 %v252_v19 }
 0x123   :  { %v366_v23 = vpop.eup %365 }
 0x124   :  { %272 = vrot.lane.b32.xlu1 %v366_v23, %s509_s22  ;;  %261 = vrot.lane.b32.xlu0 %v366_v23, %s510_s23  ;;  %v368_v24 = vpop.eup %367 }
 0x128   :  { %266 = vrot.lane.b32.xlu0 %v368_v24, %s511_s24 }
 0x196   :  { %v262_v25 = vpop.permute.xlu0 %261 }
 0x197   :  { %v264_v28 = vmul.f32 %v262_v25, %v89_v26 }
 0x19a   :  { %v267_v27 = vpop.permute.xlu0 %266 }
 0x19b   :  { %v269_v29 = vmul.f32 %v366_v23, %v267_v27 }
 0x19d   :  { %v270_v30 = vadd.f32 %v269_v29, %v264_v28 }
 0x19f   :  { %369 = vtanh.f32 %v270_v30  ;;  %277 = vst.msk [vmem:[#allocation3] sm:$0xff] %vm83_vm1, %v270_v30  ;;  %282 = vst.msk [vmem:[#allocation13] sm:$0xff] %vm83_vm1, %v270_v30 }
 0x1a0   :  { %462 = shalt.err (!%p459_p10)
}
 0x1a1   :  { %302 = dma.vmem_to_hbm [thread:$0]  %s300_s25, 128, %s593_s7, [#allocation14]   ;;  %v273_v32 = vpop.permute.xlu1 %272 }
 0x1a2   :  { %s513_s29 = smov [#allocation12]  }
 0x1a3   :  { %s289_s30 = sshll.u32 %s513_s29, 4  ;;  %s290_s30 = int_to_ptr.vmem [resolvable:$true] %s289_s30 }
 0x1a4   :  { %s471_s8 = scalar_lea.vmem %s290_s30, 128  ;;  %p476_p12 = scmp.lt.s32.totalorder %s290_s30, %s290_s30 }
 0x1a5   :  { %p472_p11 = scmp.ne.s32.totalorder %s290_s30, %s471_s8  ;;  %p477_p13 = scmp.lt.s32.totalorder %s471_s8, %s471_s8 }
 0x1a7   :  { %p478_p0 = por %p477_p13, %p476_p12 }
 0x1a9   :  { %p479_p1 = pnand %p478_p0, %p472_p11 }
 0x1ac   :  { %v370_v31 = vpop.eup %369 }
 0x1ad   :  { %v275_v33 = vmul.f32 %v370_v31, %v273_v32 }
 0x1af   :  { %276 = vst.msk [vmem:[#allocation2] sm:$0xff] %vm83_vm1, %v275_v33  ;;  %278 = vst.msk [vmem:[#allocation12] sm:$0xff] %vm83_vm1, %v275_v33 }
 0x1b0   :  { %482 = shalt.err (!%p479_p1)
}
 0x1b1   :  { %292 = dma.vmem_to_hbm [thread:$0]  %s290_s30, 128, %s592_s6, [#allocation6]  }
 0x1b2   :  { %497 = dma.done.wait [#allocation6], 128  }
 0x1b3   :  { %498 = vsyncadd [#allocation6], 4294967168 }
 0x1b4   :  { %499 = dma.done.wait [#allocation14], 128  }
 0x1b5   :  { %500 = vsyncadd [#allocation14], 4294967168 }
 0x1b6   :  { %309 = vsyncpa [#allocation5], 1 }
 0x1b7   :  { %310 = vsyncpa [#allocation8], 1 }
 0x1b8   :  { %311 = vsyncpa [#allocation11], 1 }
 0x1b9   :  { %312 = vsyncpa [#allocation6], 1 }
 0x1ba   :  { %313 = vsyncpa [#allocation14], 1 }

</bundles_post_ra>
